<compile_context>
chip_gen: v5e
topology: v5e:2x2
jax: 0.10.0
libtpu: 0.0.40
codegen_flags: <defaults>
</compile_context>

<pallas_src>
import jax
import jax.numpy as jnp
from jax import lax
from jax.experimental import pallas as pl
from jax.experimental.pallas import tpu as pltpu


# ----------------------------------------------------------------------------
# Fused Pallas kernel: Linear(32,32)  +  Conv2d(4->8, 3x3, pad=1) as one matmul
# ----------------------------------------------------------------------------
def _fused_kernel(x0_ref, w0_ref, b0_ref, p_ref, w1_ref, b1_ref, o0_ref, o1_ref):
    # ---- child module0: Linear --------------------------------------------
    # x0_ref: (M, Din)   w0_ref: (Din, Dout)   b0_ref: (1, Dout)   o0_ref: (M, Dout)
    o0_ref[...] = (
        jnp.dot(x0_ref[...], w0_ref[...], preferred_element_type=jnp.float32)
        + b0_ref[...]
    ).astype(o0_ref.dtype)

    # ---- child module1: Conv2d 3x3, stride 1, pad 1 (im2col done wrapper-side) ----
    # p_ref : (9*Cin, N*H*W)   pre-formed patches, columns ordered batch-major
    # w1_ref: (Cout, 9*Cin)    flattened weights, k = (kh*3 + kw)*Cin + ci
    # b1_ref: (Cout, N*H*W)    pre-broadcast bias (lane-aligned VALU add)
    # o1_ref: (N, Cout, H*W)   NCHW with spatial flattened (lane-dense stores)
    y = (
        jnp.dot(w1_ref[...], p_ref[...], preferred_element_type=jnp.float32)
        + b1_ref[...]
    ).astype(o1_ref.dtype)                               # (Cout, N*H*W)

    N, _, HW = o1_ref.shape
    for n in range(N):                                   # N=2 -> static unroll
        # column offsets n*HW are multiples of 128 -> unmasked lane-aligned stores
        o1_ref[n] = y[:, n * HW:(n + 1) * HW]


# ----------------------------------------------------------------------------
# Wrapper: one jitted function -> one pallas_call (pad + im2col glue fuses around it)
# ----------------------------------------------------------------------------
@jax.jit
def _fused_forward(x0, x1, lin_wt, lin_b2, conv_w2, conv_bb):
    """x0: (B, S, Din); x1: (N, Cin, H, W) NCHW.
    lin_wt: (Din, Dout); lin_b2: (1, Dout);
    conv_w2: (Cout, 9*Cin); conv_bb: (Cout, N*H*W) pre-broadcast bias.
    """
    B, S, Din = x0.shape
    Dout = lin_wt.shape[1]
    N, Cin, H, W = x1.shape
    Cout = conv_w2.shape[0]

    x0_2d = x0.reshape(B * S, Din)                                   # free reshape

    # Wrapper-side im2col (one XLA fusion with the pad): build the lane-dense
    # (9*Cin, N*H*W) patches slab so the kernel body is pure load + dot + store.
    xp = jnp.pad(x1, ((0, 0), (0, 0), (1, 1), (1, 1)))               # 1-pixel halo
    taps = [xp[:, :, kh:kh + H, kw:kw + W] for kh in range(3) for kw in range(3)]
    patches = jnp.concatenate(taps, axis=1)                          # (N, 9*Cin, H, W)
    patches = patches.reshape(N, 9 * Cin, H * W)                     # (N, 9*Cin, H*W)
    patches = patches.transpose(1, 0, 2).reshape(9 * Cin, N * H * W) # (9*Cin, N*H*W)

    out0_2d, out1_flat = pl.pallas_call(
        _fused_kernel,
        out_shape=(
            jax.ShapeDtypeStruct((B * S, Dout), x0.dtype),
            jax.ShapeDtypeStruct((N, Cout, H * W), x1.dtype),
        ),
        grid=(1,),
        in_specs=[
            pl.BlockSpec((B * S, Din), lambda i: (0, 0)),
            pl.BlockSpec((Din, Dout), lambda i: (0, 0)),
            pl.BlockSpec((1, Dout), lambda i: (0, 0)),
            pl.BlockSpec((9 * Cin, N * H * W), lambda i: (0, 0)),
            pl.BlockSpec((Cout, 9 * Cin), lambda i: (0, 0)),
            pl.BlockSpec((Cout, N * H * W), lambda i: (0, 0)),
        ],
        out_specs=(
            pl.BlockSpec((B * S, Dout), lambda i: (0, 0)),
            pl.BlockSpec((N, Cout, H * W), lambda i: (0, 0, 0)),
        ),
        compiler_params=pltpu.CompilerParams(
            dimension_semantics=("arbitrary",)),   # keep tiny work on one TensorCore
    )(x0_2d, lin_wt, lin_b2, patches, conv_w2, conv_bb)

    out0 = out0_2d.reshape(B, S, Dout)
    out1 = out1_flat.reshape(N, Cout, H, W)          # free reshape -> NCHW exactly
    return out0, out1


# ----------------------------------------------------------------------------
# MultiMultiInputModule equivalent
# ----------------------------------------------------------------------------
class MultiMultiInputModulePallas:
    """Children: [Linear(32,32), Conv2d(4,8,3,pad=1), constant tensor].

    forward(*inputs) consumes one input per *module* child (the constant/Lambda
    child takes none) and returns the tuple of all child outputs, mirroring
    MultiMultiInputModule.forward exactly.
    """

    def __init__(self, key, const_tensor):
        k0, k1, k2, k3 = jax.random.split(key, 4)
        Din, Dout = 32, 32
        Cin, Cout = 4, 8
        # Deterministic synthetic parameters (shapes from the nn module specs).
        self.lin_w = jax.random.normal(k0, (Dout, Din), jnp.float32) * 0.05
        self.lin_b = jax.random.normal(k1, (Dout,), jnp.float32) * 0.05
        self.conv_w = jax.random.normal(k2, (Cout, Cin, 3, 3), jnp.float32) * 0.05
        self.conv_b = jax.random.normal(k3, (Cout,), jnp.float32) * 0.05
        self.const = const_tensor

        # Kernel-friendly parameter layouts, precomputed once at init (zero runtime cost).
        self.lin_wt = jnp.transpose(self.lin_w)                       # (Din, Dout)
        self.lin_b2 = self.lin_b.reshape(1, Dout)                     # (1, Dout)
        # OIHW -> (Cout, kh, kw, Cin) -> (Cout, 9*Cin), k = (kh*3 + kw)*Cin + ci
        self.conv_w2 = jnp.transpose(self.conv_w, (0, 2, 3, 1)).reshape(Cout, 9 * Cin)
        self.conv_b2 = self.conv_b.reshape(Cout, 1)                   # (Cout, 1)
        self._conv_bb = None                                          # lazy (Cout, N*H*W)

    def _conv_bias_broadcast(self, width):
        # Pre-broadcast bias to the full output lane width once per input shape
        # (materialized outside jit -> zero per-call cost, lane-aligned VALU add in kernel).
        if self._conv_bb is None or self._conv_bb.shape[1] != width:
            self._conv_bb = jnp.broadcast_to(
                self.conv_b2, (self.conv_b2.shape[0], width))
            self._conv_bb = jax.device_put(self._conv_bb)
        return self._conv_bb

    def forward(self, *inputs):
        it = iter(inputs)
        x0 = next(it)                                  # module0 input
        x1 = next(it)                                  # module1 input
        N, _, H, W = x1.shape
        conv_bb = self._conv_bias_broadcast(N * H * W)
        out0, out1 = _fused_forward(x0, x1, self.lin_wt, self.lin_b2,
                                    self.conv_w2, conv_bb)
        out2 = self.const                              # tensor2 (Lambda, no input)
        return (out0, out1, out2)

    __call__ = forward


# ----------------------------------------------------------------------------
if __name__ == "__main__":
    key = jax.random.PRNGKey(0)
    k_x0, k_x1, k_c, k_p = jax.random.split(key, 4)

    # Inputs: one per module child.
    x0 = jax.random.normal(k_x0, (2, 8, 32), jnp.float32)      # for Linear
    x1 = jax.random.normal(k_x1, (2, 4, 16, 16), jnp.float32)  # for Conv2d (NCHW)
    const_tensor = jax.random.normal(k_c, (2, 16), jnp.float32)

    model = MultiMultiInputModulePallas(k_p, const_tensor)
    outputs = model(x0, x1)
    outputs = jax.block_until_ready(outputs)

    # Reference check (plain JAX) for the two compute paths.
    ref0 = jnp.einsum("bsd,od->bso", x0, model.lin_w) + model.lin_b
    ref1 = lax.conv_general_dilated(
        x1, model.conv_w, window_strides=(1, 1), padding="SAME",
        dimension_numbers=("NCHW", "OIHW", "NCHW")) + model.conv_b.reshape(1, -1, 1, 1)

    assert outputs[0].shape == (2, 8, 32)
    assert outputs[1].shape == (2, 8, 16, 16)
    assert outputs[2].shape == (2, 16)
    assert jnp.allclose(outputs[0], ref0, atol=1e-3, rtol=1e-3)
    assert jnp.allclose(outputs[1], ref1, atol=1e-3, rtol=1e-3)
    assert jnp.array_equal(outputs[2], const_tensor)

    print("KERNEL_OK")
</pallas_src>

<mosaic_0001>
module attributes {stable_mosaic.version = 11 : i64} {
  func.func @_fused_kernel(%arg0: i32, %arg1: memref<16x32xf32, #tpu.memory_space<vmem>>, %arg2: memref<32x32xf32, #tpu.memory_space<vmem>>, %arg3: memref<1x32xf32, #tpu.memory_space<vmem>>, %arg4: memref<36x512xf32, #tpu.memory_space<vmem>>, %arg5: memref<8x36xf32, #tpu.memory_space<vmem>>, %arg6: memref<8x512xf32, #tpu.memory_space<vmem>>, %arg7: memref<16x32xf32, #tpu.memory_space<vmem>>, %arg8: memref<2x8x256xf32, #tpu.memory_space<vmem>>) attributes {dimension_semantics = [#tpu.dimension_semantics<arbitrary>], iteration_bounds = array<i64: 1>, scalar_prefetch = 0 : i64, scratch_operands = 0 : i64, tpu.core_type = #tpu.core_type<tc>, window_params = [{pipeline_mode = #tpu.pipeline_mode<synchronous>, transform_indices = @transform_0, window_bounds = array<i64: 16, 32>}, {pipeline_mode = #tpu.pipeline_mode<synchronous>, transform_indices = @transform_1, window_bounds = array<i64: 32, 32>}, {pipeline_mode = #tpu.pipeline_mode<synchronous>, transform_indices = @transform_2, window_bounds = array<i64: 1, 32>}, {pipeline_mode = #tpu.pipeline_mode<synchronous>, transform_indices = @transform_3, window_bounds = array<i64: 36, 512>}, {pipeline_mode = #tpu.pipeline_mode<synchronous>, transform_indices = @transform_4, window_bounds = array<i64: 8, 36>}, {pipeline_mode = #tpu.pipeline_mode<synchronous>, transform_indices = @transform_5, window_bounds = array<i64: 8, 512>}, {pipeline_mode = #tpu.pipeline_mode<synchronous>, transform_indices = @transform_6, window_bounds = array<i64: 16, 32>}, {pipeline_mode = #tpu.pipeline_mode<synchronous>, transform_indices = @transform_7, window_bounds = array<i64: 2, 8, 256>}]} {
    %c0 = arith.constant 0 : index
    %c0_0 = arith.constant 0 : index
    %0 = vector.load %arg1[%c0, %c0_0] : memref<16x32xf32, #tpu.memory_space<vmem>>, vector<16x32xf32>
    %c0_1 = arith.constant 0 : index
    %c0_2 = arith.constant 0 : index
    %1 = vector.load %arg2[%c0_1, %c0_2] : memref<32x32xf32, #tpu.memory_space<vmem>>, vector<32x32xf32>
    %cst = arith.constant dense<0.000000e+00> : vector<16x32xf32>
    %2 = tpu.matmul %0, %1, %cst {dimension_numbers = #tpu.dot_dimension_numbers<[1], [0], [0], [1], [0, 0, 1, 1], [], []>} : vector<16x32xf32>, vector<32x32xf32>, vector<16x32xf32> -> vector<16x32xf32>
    %c0_3 = arith.constant 0 : index
    %c0_4 = arith.constant 0 : index
    %3 = vector.load %arg3[%c0_3, %c0_4] : memref<1x32xf32, #tpu.memory_space<vmem>>, vector<1x32xf32>
    %4 = vector.broadcast %3 : vector<1x32xf32> to vector<16x32xf32>
    %5 = arith.addf %2, %4 : vector<16x32xf32>
    %c0_5 = arith.constant 0 : index
    %c0_6 = arith.constant 0 : index
    %6 = vector.load %arg7[%c0_5, %c0_6] : memref<16x32xf32, #tpu.memory_space<vmem>>, vector<16x32xf32>
    tpu.vector_store %arg7[%c0_5, %c0_6], %5 {strides = array<i32>} : memref<16x32xf32, #tpu.memory_space<vmem>>, vector<16x32xf32>,
    %c0_7 = arith.constant 0 : index
    %c0_8 = arith.constant 0 : index
    %7 = vector.load %arg5[%c0_7, %c0_8] : memref<8x36xf32, #tpu.memory_space<vmem>>, vector<8x36xf32>
    %c0_9 = arith.constant 0 : index
    %c0_10 = arith.constant 0 : index
    %8 = vector.load %arg4[%c0_9, %c0_10] : memref<36x512xf32, #tpu.memory_space<vmem>>, vector<36x512xf32>
    %cst_11 = arith.constant dense<0.000000e+00> : vector<8x512xf32>
    %9 = tpu.matmul %7, %8, %cst_11 {dimension_numbers = #tpu.dot_dimension_numbers<[1], [0], [0], [1], [0, 0, 1, 1], [], []>} : vector<8x36xf32>, vector<36x512xf32>, vector<8x512xf32> -> vector<8x512xf32>
    %c0_12 = arith.constant 0 : index
    %c0_13 = arith.constant 0 : index
    %10 = vector.load %arg6[%c0_12, %c0_13] : memref<8x512xf32, #tpu.memory_space<vmem>>, vector<8x512xf32>
    %11 = arith.addf %9, %10 : vector<8x512xf32>
    %12 = vector.extract_strided_slice %11 {offsets = [0, 0], sizes = [8, 256], strides = [1, 1]} : vector<8x512xf32> to vector<8x256xf32>
    %c0_14 = arith.constant 0 : index
    %c0_15 = arith.constant 0 : index
    %c0_16 = arith.constant 0 : index
    %13 = vector.load %arg8[%c0_14, %c0_15, %c0_16] : memref<2x8x256xf32, #tpu.memory_space<vmem>>, vector<1x8x256xf32>
    %14 = vector.shape_cast %13 : vector<1x8x256xf32> to vector<8x256xf32>
    %15 = vector.shape_cast %12 : vector<8x256xf32> to vector<1x8x256xf32>
    tpu.vector_store %arg8[%c0_14, %c0_15, %c0_16], %15 {strides = array<i32>} : memref<2x8x256xf32, #tpu.memory_space<vmem>>, vector<1x8x256xf32>,
    %16 = vector.extract_strided_slice %11 {offsets = [0, 256], sizes = [8, 256], strides = [1, 1]} : vector<8x512xf32> to vector<8x256xf32>
    %c1 = arith.constant 1 : index
    %c0_17 = arith.constant 0 : index
    %c0_18 = arith.constant 0 : index
    %17 = vector.load %arg8[%c1, %c0_17, %c0_18] : memref<2x8x256xf32, #tpu.memory_space<vmem>>, vector<1x8x256xf32>
    %18 = vector.shape_cast %17 : vector<1x8x256xf32> to vector<8x256xf32>
    %19 = vector.shape_cast %16 : vector<8x256xf32> to vector<1x8x256xf32>
    tpu.vector_store %arg8[%c1, %c0_17, %c0_18], %19 {strides = array<i32>} : memref<2x8x256xf32, #tpu.memory_space<vmem>>, vector<1x8x256xf32>,
    return
  }
  func.func @transform_0(%arg0: i32) -> (i32, i32) {
    %c0_i32 = arith.constant 0 : i32
    %c0_i32_0 = arith.constant 0 : i32
    %c0_i32_1 = arith.constant 0 : i32
    return %c0_i32, %c0_i32_0 : i32, i32
  }
  func.func @transform_1(%arg0: i32) -> (i32, i32) {
    %c0_i32 = arith.constant 0 : i32
    %c0_i32_0 = arith.constant 0 : i32
    %c0_i32_1 = arith.constant 0 : i32
    return %c0_i32, %c0_i32_0 : i32, i32
  }
  func.func @transform_2(%arg0: i32) -> (i32, i32) {
    %c0_i32 = arith.constant 0 : i32
    %c0_i32_0 = arith.constant 0 : i32
    %c0_i32_1 = arith.constant 0 : i32
    return %c0_i32, %c0_i32_0 : i32, i32
  }
  func.func @transform_3(%arg0: i32) -> (i32, i32) {
    %c0_i32 = arith.constant 0 : i32
    %c0_i32_0 = arith.constant 0 : i32
    %c0_i32_1 = arith.constant 0 : i32
    return %c0_i32, %c0_i32_0 : i32, i32
  }
  func.func @transform_4(%arg0: i32) -> (i32, i32) {
    %c0_i32 = arith.constant 0 : i32
    %c0_i32_0 = arith.constant 0 : i32
    %c0_i32_1 = arith.constant 0 : i32
    return %c0_i32, %c0_i32_0 : i32, i32
  }
  func.func @transform_5(%arg0: i32) -> (i32, i32) {
    %c0_i32 = arith.constant 0 : i32
    %c0_i32_0 = arith.constant 0 : i32
    %c0_i32_1 = arith.constant 0 : i32
    return %c0_i32, %c0_i32_0 : i32, i32
  }
  func.func @transform_6(%arg0: i32) -> (i32, i32) {
    %c0_i32 = arith.constant 0 : i32
    %c0_i32_0 = arith.constant 0 : i32
    %c0_i32_1 = arith.constant 0 : i32
    return %c0_i32, %c0_i32_0 : i32, i32
  }
  func.func @transform_7(%arg0: i32) -> (i32, i32, i32) {
    %c0_i32 = arith.constant 0 : i32
    %c0_i32_0 = arith.constant 0 : i32
    %c0_i32_1 = arith.constant 0 : i32
    %c0_i32_2 = arith.constant 0 : i32
    return %c0_i32, %c0_i32_0, %c0_i32_1 : i32, i32, i32
  }
}

</mosaic_0001>

<bundles_post_ra>
// kernel: _fused_forward.1
= control target key start
LH: loop header
LB: loop body
LE: loop exit
PB: predicated region body
PF: predicated region fallthrough
CT: control target
= control target key end

     0   :  { %vm97_vm0 = vcmask 1043456   ;;  %vm36_vm1 = vcmask 261120   ;;  %vm93_vm2 = vcmask 293888   ;;  %s425_s0 = inlined_call_operand.vmem [shape: f32[16,32], index: 0, kind: input, shape index: {}]   ;;  %s426_s1 = inlined_call_operand.vmem [shape: f32[32,32], index: 1, kind: input, shape index: {}]   ;;  %s427_s2 = inlined_call_operand.vmem [shape: f32[1,32], index: 2, kind: input, shape index: {}]   ;;  %s428_s3 = inlined_call_operand.vmem [shape: f32[36,512], index: 3, kind: input, shape index: {}]   ;;  %s429_s4 = inlined_call_operand.vmem [shape: f32[8,36], index: 4, kind: input, shape index: {}]   ;;  %s430_s5 = inlined_call_operand.vmem [shape: f32[8,512], index: 5, kind: input, shape index: {}]   ;;  %s431_s6 = inlined_call_operand.hbm [shape: f32[16,32], index: 6, kind: output, shape index: {0}]   ;;  %s432_s7 = inlined_call_operand.vmem [shape: f32[2,8,256], index: 7, kind: output, shape index: {1}]  }
   0x1   :  { %v85_v0 = vld [vmem:[%s428_s3 + $0x80] sm:$0xf]  ;;  %v31_v1 = vld [vmem:[%s426_s1 + $0x18] sm:$0xff]  ;;  %v86_v3 = vld [vmem:[%s428_s3 + $0x88] sm:$0xf] }
   0x2   :  { %v81_v2 = vld [vmem:[%s428_s3 + $0x60] sm:$0xff]  ;;  %219 = vmatpush.msk.msra.mxu1 %vm97_vm0, %v85_v0  ;;  %55 = vmatpush.msra.mxu0 %v31_v1  ;;  %v87_v4 = vld [vmem:[%s428_s3 + $0x90] sm:$0xf]  ;;  %v82_v7 = vld [vmem:[%s428_s3 + $0x68] sm:$0xff] }
   0x3   :  { %v30_v5 = vld [vmem:[%s426_s1 + $0x10] sm:$0xff]  ;;  %221 = vmatpush.msk.msra.mxu2 %vm97_vm0, %v86_v3  ;;  %223 = vmatpush.msk.msra.mxu3 %vm97_vm0, %v87_v4  ;;  %v77_v6 = vld [vmem:[%s428_s3 + $0x40] sm:$0xff]  ;;  %v29_v9 = vld [vmem:[%s426_s1 + $0x8] sm:$0xff] }
   0x4   :  { %v83_v8 = vld [vmem:[%s428_s3 + $0x70] sm:$0xff]  ;;  %122 = vmatpush.msra.mxu1 %v81_v2  ;;  %56 = vmatpush.msra.mxu0 %v30_v5  ;;  %v78_v10 = vld [vmem:[%s428_s3 + $0x48] sm:$0xff]  ;;  %v73_v11 = vld [vmem:[%s428_s3 + $0x20] sm:$0xff] }
   0x5   :  { %142 = vmatpush.msra.mxu2 %v82_v7  ;;  %162 = vmatpush.msra.mxu3 %v83_v8  ;;  %v79_v12 = vld [vmem:[%s428_s3 + $0x50] sm:$0xff]  ;;  %v28_v13 = vld [vmem:[%s426_s1] sm:$0xff]  ;;  %v74_v15 = vld [vmem:[%s428_s3 + $0x28] sm:$0xff] }
   0x6   :  { %123 = vmatpush.msra.mxu1 %v77_v6  ;;  %57 = vmatpush.msra.mxu0 %v29_v9  ;;  %v26_v14 = vld [vmem:[%s425_s0] sm:$0xff]  ;;  %v75_v17 = vld [vmem:[%s428_s3 + $0x30] sm:$0xff]  ;;  %v88_v18 = vld [vmem:[%s428_s3 + $0x98] sm:$0xf] }
   0x7   :  { %143 = vmatpush.msra.mxu2 %v78_v10  ;;  %163 = vmatpush.msra.mxu3 %v79_v12  ;;  %v69_v16 = vld [vmem:[%s428_s3] sm:$0xff]  ;;  %v70_v19 = vld [vmem:[%s428_s3 + $0x8] sm:$0xff]  ;;  %v71_v21 = vld [vmem:[%s428_s3 + $0x10] sm:$0xff] }
   0x8   :  { %124 = vmatpush.msra.mxu1 %v73_v11  ;;  %58 = vmatpush.msra.mxu0 %v28_v13  ;;  %v68_v20 = vld [vmem:[%s429_s4] sm:$0xff]  ;;  %v84_v22 = vld [vmem:[%s428_s3 + $0x78] sm:$0xff] }
   0x9   :  { %217 = vmatmul.msk.f32.vlgmr.msra.gmra.mxu0 %vm36_vm1, %v26_v14  ;;  %144 = vmatpush.msra.mxu2 %v74_v15 }
   0xa   :  { %125 = vmatpush.msra.mxu1 %v69_v16  ;;  %164 = vmatpush.msra.mxu3 %v75_v17 }
   0xb   :  { %13 = vsyncpa [#allocation3], 0  ;;  %145 = vmatpush.msra.mxu2 %v70_v19  ;;  %220 = vmatmul.msk.f32.vlgmr.msra.gmra.mxu1 %vm93_vm2, %v68_v20  ;;  %v80_v23 = vld [vmem:[%s428_s3 + $0x58] sm:$0xff]  ;;  %v27_v25 = vld [vmem:[%s425_s0 + $0x8] sm:$0xff]  ;;  %s259_s0 = smov [#allocation2]   ;;  %s201_s13 = sshll.u32 %s431_s6, 4  ;;  %s202_s13 = int_to_ptr.hbm [resolvable:$true] %s201_s13 }
   0xc   :  { %225 = vmatpush.msk.msrb.mxu1 %vm97_vm0, %v88_v18  ;;  %165 = vmatpush.msra.mxu3 %v71_v21  ;;  %v76_v24 = vld [vmem:[%s428_s3 + $0x38] sm:$0xff]  ;;  %v232_v27 = vld [vmem:[%s427_s2] ss:$0 sm:$0xff]  ;;  %v90_v34 = vld [vmem:[%s430_s5 + $0x8] sm:$0xff]  ;;  %s260_s6 = smov 128   ;;  %s261_s20 = smov 8  }
   0xd   :  { %222 = vmatmul.msk.f32.vlgmr.msra.gmra.mxu2 %vm93_vm2, %v68_v20  ;;  %224 = vmatmul.msk.f32.vlgmr.msra.gmra.mxu3 %vm93_vm2, %v68_v20  ;;  %v72_v26 = vld [vmem:[%s428_s3 + $0x18] sm:$0xff]  ;;  %v89_v30 = vld [vmem:[%s430_s5] sm:$0xff]  ;;  %s199_s3 = sshll.u32 %s259_s0, 4  ;;  %v91_v36 = vld [vmem:[%s430_s5 + $0x10] sm:$0xff]  ;;  %s200_s3 = int_to_ptr.vmem [resolvable:$true] %s199_s3 }
   0xe   :  { %182 = vmatpush.msrb.mxu1 %v84_v22  ;;  %v92_v37 = vld [vmem:[%s430_s5 + $0x18] sm:$0xff] }
  0x10   :  { %183 = vmatpush.msrb.mxu1 %v80_v23 }
  0x11   :  { %218 = vmatmul.msk.f32.gmra.mxu0 %vm36_vm1, %v27_v25 }
  0x12   :  { %184 = vmatpush.msrb.mxu1 %v76_v24 }
  0x14   :  { %185 = vmatpush.msrb.mxu1 %v72_v26 }
  0x15   :  { %226 = vmatmul.msk.f32.vlgmr.msrb.gmra.mxu1 %vm93_vm2, %v68_v20 }
  0x86   :  { %v60_v28 = vpop.f32.mrf.mxu0 }
  0x87   :  { %v61_v29 = vadd.f32 %v232_v27, %v60_v28 }
  0x88   :  { %v127_v31 = vpop.f32.mrf.mxu1 }
  0x89   :  { %66 = vst.msk [vmem:[#allocation2] sm:$0xff] %vm36_vm1, %v61_v29  ;;  %v128_v32 = vadd.f32 %v127_v31, %v89_v30 }
  0x8b   :  { %190 = vst [vmem:[%s432_s7] sm:$0xff] %v128_v32 }
  0x8e   :  { %v63_v33 = vpop.f32.mrf.mxu0 }
  0x8f   :  { %v64_v35 = vadd.f32 %v232_v27, %v63_v33 }
  0x90   :  { %v147_v38 = vpop.f32.mrf.mxu2  ;;  %v167_v40 = vpop.f32.mrf.mxu3 }
  0x91   :  { %67 = vst.msk [vmem:[#allocation2 + $0x8] sm:$0xff] %vm36_vm1, %v64_v35  ;;  %v148_v39 = vadd.f32 %v147_v38, %v90_v34  ;;  %v168_v42 = vadd.f32 %v167_v40, %v91_v36 }
  0x92   :  { %v187_v41 = vpop.f32.mrf.mxu1  ;;  %207 = dma.vmem_to_hbm [thread:$0]  %s200_s3, 256, %s202_s13, [#allocation3], %s260_s6, %s260_s6, %s261_s20  }
  0x93   :  { %v188_v43 = vadd.f32 %v187_v41, %v92_v37  ;;  %191 = vst [vmem:[%s432_s7 + $0x8] sm:$0xff] %v148_v39 }
  0x94   :  { %227 = vst [vmem:[%s432_s7 + $0x10] sm:$0xff] %v168_v42 }
  0x95   :  { %228 = vst [vmem:[%s432_s7 + $0x18] sm:$0xff] %v188_v43 }
  0x96   :  { %257 = dma.done.wait [#allocation3], 256  }
  0x97   :  { %258 = vsyncadd [#allocation3], 4294967040 }
  0x98   :  { %216 = vsyncpa [#allocation3], 1 }

</bundles_post_ra>
